<compile_context>
chip_gen: v5e
topology: v5e:2x2
jax: 0.10.0
libtpu: 0.0.40
codegen_flags: <defaults>
</compile_context>

<pallas_src>
import functools

import jax
import jax.numpy as jnp
from jax.experimental import pallas as pl
from jax.experimental.pallas import tpu as pltpu


def _kanvolution_kernel(x_ref, wp_ref, *rest, m, has_q, op_dtype, chain_f32):
    """One (Cout, T) output tile of the fused 1x1 kanvolution.

    Channel-major / lane-dense layout:
      x_ref  : (Cin_pad, T)          input pixels, spatial axis on lanes
      wp_ref : (Cout, m*Cin_pad)     powers-stacked P weights (zero-padded)
      wq_ref : (Cout, m*Cin_pad)     powers-stacked Q weights (only if has_q)
      bias   : (Cout, 1)             bias of convp_1 (the only conv with bias)
      o_ref  : (Cout, T)             output tile
    """
    if has_q:
        wq_ref, bias_ref, o_ref = rest
    else:
        bias_ref, o_ref = rest

    x = x_ref[...]
    chain_dt = jnp.float32 if chain_f32 else x.dtype
    xc = x.astype(chain_dt)

    # Power chain x, x^2, ..., x^m stacked along sublanes -> one big-K MXU
    # operand (m*Cin_pad, T) instead of m skinny K=Cin dots.
    powers = [xc]
    for _ in range(1, m):
        powers.append(powers[-1] * xc)
    xp = jnp.concatenate(powers, axis=0) if m > 1 else powers[0]
    xp = xp.astype(op_dtype)

    bias = jnp.broadcast_to(bias_ref[...].astype(jnp.float32),
                            (o_ref.shape[0], o_ref.shape[1]))
    sum_p = bias + jnp.dot(wp_ref[...], xp, preferred_element_type=jnp.float32)

    if has_q:
        sum_q = jnp.dot(wq_ref[...], xp, preferred_element_type=jnp.float32)
        denom = 1.0 + jnp.abs(sum_q)
        # EUP approximate reciprocal + one Newton step: frees VALU slots while
        # keeping ~f32 accuracy (rel. error ~2^-24 after refinement).
        r = pl.reciprocal(denom, approx=True)
        r = r * (2.0 - denom * r)
        out = sum_p * r
    else:
        out = sum_p  # q == 0: the denominator is exactly 1
    o_ref[...] = out.astype(o_ref.dtype)


def _vmem_capacity_bytes():
    try:
        return int(pltpu.get_tpu_info().vmem_capacity_bytes)
    except Exception:
        # TODO(synk): conservative fallback when the hardware query is unavailable.
        return 64 << 20


def _pick_tile_hw(hw, n_batch, per_lane_bytes, vmem_target_bytes, min_grid_steps=8):
    """Largest legal lane tile (multiple of 128, <= HW) that fits a per-step
    byte budget, preferring divisors of HW (unmasked stores / no dead last
    step) and keeping >= min_grid_steps total grid steps (v7x 2-TC warmth)."""
    if hw <= 128:
        return int(hw)  # full-extent block is the only legal / sensible choice
    max_t = hw if hw % 128 == 0 else (hw // 128) * 128
    t = (vmem_target_bytes // max(per_lane_bytes, 1)) // 128 * 128
    t = int(max(128, min(max_t, t)))
    # Prefer a tile that divides HW evenly (don't shrink below half the budget).
    if hw % t != 0:
        cand = t
        while cand >= max(128, t // 2):
            if hw % cand == 0:
                t = cand
                break
            cand -= 128
    # Keep enough grid steps for megacore sharding + a warm double-buffer.
    while t > 128 and n_batch * pl.cdiv(hw, t) < min_grid_steps:
        t = max(128, (t // 2) // 128 * 128)
    return int(t)


def kanvolution_layer(x_nchw, wp, wq, bias_p1, *, order_p, order_q,
                      tile_hw=None, mxu_dtype=None, bf16_power_chain=False):
    """Fused 1x1 kanvolution.

    x_nchw : (N, Cin, H, W)
    wp     : (order_p, Cin, Cout)   convp_1..convp_p weights (1x1 squeezed)
    wq     : (order_q, Cin, Cout)   convq_1..convq_q weights (ignored if q==0)
    bias_p1: (Cout,)                bias of convp_1
    mxu_dtype : optional dtype for the MXU operands (e.g. jnp.bfloat16 on v5e
                for ~2-3x matmul throughput, accuracy permitting).
    bf16_power_chain : keep the power chain in bf16 for bf16 inputs
                (v6e/v7x VALU saving; keep False on v5e / for f32 accuracy).
    returns: (N, Cout, H, W)
    """
    N, Cin, H, W = x_nchw.shape
    Cout = wp.shape[-1]
    HW = H * W

    p = int(order_p)
    q = int(order_q)
    assert p >= 1, "convp_1 always exists in the module"
    has_q = q > 0
    m = max(p, q) if has_q else p

    x_dtype = jnp.dtype(x_nchw.dtype)
    op_dtype = jnp.dtype(mxu_dtype) if mxu_dtype is not None else x_dtype
    chain_f32 = not (bf16_power_chain and x_dtype == jnp.dtype(jnp.bfloat16))
    chain_dtype = jnp.dtype(jnp.float32) if chain_f32 else x_dtype

    # NCHW is already channel-major: a pure reshape gives (N, Cin, HW) with the
    # spatial axis on lanes.  Pad channels to a multiple of 8 so the in-kernel
    # power-stack concat and every K block are sublane-tile aligned (no-op for
    # Cin that is already a multiple of 8).
    Cin_p = ((Cin + 7) // 8) * 8
    x3d = x_nchw.reshape(N, Cin, HW)
    if Cin_p != Cin:
        x3d = jnp.pad(x3d, ((0, 0), (0, Cin_p - Cin), (0, 0)))

    def flat_weights(w):
        # (k, Cin, Cout) -> (Cout, m*Cin_p): column block i holds the weights
        # for power i+1 (channel-padded and zero-padded past the real order
        # so both dots share the same stacked XP operand).
        k = w.shape[0]
        wt = jnp.transpose(w, (0, 2, 1))                       # (k, Cout, Cin)
        if Cin_p != Cin:
            wt = jnp.pad(wt, ((0, 0), (0, 0), (0, Cin_p - Cin)))
        wf = jnp.transpose(wt, (1, 0, 2)).reshape(Cout, k * Cin_p)
        if k < m:
            wf = jnp.concatenate(
                [wf, jnp.zeros((Cout, (m - k) * Cin_p), wf.dtype)], axis=1)
        return wf.astype(op_dtype)

    wp_flat = flat_weights(wp)
    wq_flat = flat_weights(wq) if has_q else None
    bias2d = bias_p1.reshape(Cout, 1).astype(jnp.float32)

    x_isz = x_dtype.itemsize
    op_isz = op_dtype.itemsize
    chain_isz = chain_dtype.itemsize

    # Per-spatial-lane VMEM bytes: double-buffered in/out tiles plus in-kernel
    # temporaries (power stack, optional cast copy, accumulators, out staging).
    stack_bytes = m * Cin_p * chain_isz
    if op_dtype != chain_dtype:
        stack_bytes += m * Cin_p * op_isz
    per_lane = (2 * (Cin_p + Cout) * x_isz
                + stack_bytes
                + (1 + int(has_q)) * Cout * 4
                + Cout * x_isz)

    cap = _vmem_capacity_bytes()
    vmem_target = (4 << 20) if cap <= (64 << 20) else (8 << 20)

    if tile_hw is None:
        tile_hw = _pick_tile_hw(HW, N, per_lane, vmem_target)
    grid_hw = pl.cdiv(HW, tile_hw)

    # VMEM footprint estimate: lane-proportional tiles/temps + resident weights
    # (worst-case double-buffered) + compiler-scratch headroom; clamp to 75% of
    # physical capacity (<= 48 MiB on v7x's 64 MiB VMEM).
    n_wmats = 1 + int(has_q)
    weights_bytes = 2 * (n_wmats * Cout * m * Cin_p * op_isz + Cout * 4)
    est = per_lane * tile_hw + weights_bytes + (1 << 20)
    vmem_limit = int(min(max(2 * est, 32 << 20), int(cap * 0.75)))

    kernel = functools.partial(_kanvolution_kernel, m=m, has_q=has_q,
                               op_dtype=op_dtype, chain_f32=chain_f32)

    def run(single_buffer_weights):
        if single_buffer_weights:
            # Weights/bias have constant index_maps; a single resident buffer
            # halves their VMEM (matters for big Cin/Cout on v7x's 64 MiB).
            def const_spec(shape):
                return pl.BlockSpec(shape, lambda n, t: (0, 0),
                                    pipeline_mode=pl.Buffered(1))
        else:
            def const_spec(shape):
                return pl.BlockSpec(shape, lambda n, t: (0, 0))

        in_specs = [pl.BlockSpec((None, Cin_p, tile_hw), lambda n, t: (n, 0, t)),
                    const_spec(wp_flat.shape)]
        args = [x3d, wp_flat]
        if has_q:
            in_specs.append(const_spec(wq_flat.shape))
            args.append(wq_flat)
        in_specs.append(const_spec(bias2d.shape))
        args.append(bias2d)

        out = pl.pallas_call(
            kernel,
            out_shape=jax.ShapeDtypeStruct((N, Cout, HW), x_nchw.dtype),
            grid_spec=pltpu.PrefetchScalarGridSpec(
                num_scalar_prefetch=0,
                grid=(N, grid_hw),
                in_specs=in_specs,
                out_specs=pl.BlockSpec((None, Cout, tile_hw),
                                       lambda n, t: (n, 0, t)),
            ),
            compiler_params=pltpu.CompilerParams(
                dimension_semantics=("parallel", "parallel"),
                vmem_limit_bytes=vmem_limit),
        )(*args)
        return jax.block_until_ready(out)

    try:
        out3d = run(single_buffer_weights=True)
    except Exception:
        # TODO(synk): fallback for JAX versions without BlockSpec pipeline_mode /
        # pl.Buffered(1) support (default double-buffered weights).
        out3d = run(single_buffer_weights=False)

    return out3d.reshape(N, Cout, H, W)


def kanvolution_reference(x_nchw, wp, wq, bias_p1, *, order_p, order_q):
    """Pure-JAX reference matching the PyTorch forward exactly (NCHW math)."""
    N, Cin, H, W = x_nchw.shape
    Cout = wp.shape[-1]
    xf = x_nchw.astype(jnp.float32)
    sum_p = jnp.zeros((N, Cout, H, W), jnp.float32) \
        + bias_p1.astype(jnp.float32).reshape(1, Cout, 1, 1)
    sum_q = jnp.zeros((N, Cout, H, W), jnp.float32)
    for i in range(1, order_p + 1):
        sum_p = sum_p + jnp.einsum('nchw,co->nohw', xf ** i,
                                   wp[i - 1].astype(jnp.float32),
                                   precision='highest')
    for i in range(1, order_q + 1):
        sum_q = sum_q + jnp.einsum('nchw,co->nohw', xf ** i,
                                   wq[i - 1].astype(jnp.float32),
                                   precision='highest')
    out = sum_p / (1.0 + jnp.abs(sum_q))
    return out.astype(x_nchw.dtype)


if __name__ == "__main__":
    # Small, deterministic configuration.
    N, Cin, H, W = 2, 4, 16, 16
    Cout = 8
    ORDER_P, ORDER_Q = 5, 4

    key = jax.random.PRNGKey(0)
    kx, kwp, kwq, kb = jax.random.split(key, 4)

    # Deterministic synthetic parameters (1x1 conv weights squeezed to (Cin, Cout)).
    x = jax.random.normal(kx, (N, Cin, H, W), dtype=jnp.float32) * 0.5
    wp = jax.random.normal(kwp, (ORDER_P, Cin, Cout), dtype=jnp.float32) * 0.2
    wq = jax.random.normal(kwq, (ORDER_Q, Cin, Cout), dtype=jnp.float32) * 0.2
    bias_p1 = jax.random.normal(kb, (Cout,), dtype=jnp.float32) * 0.1

    out = kanvolution_layer(x, wp, wq, bias_p1, order_p=ORDER_P, order_q=ORDER_Q)
    out = jax.block_until_ready(out)

    ref = kanvolution_reference(x, wp, wq, bias_p1,
                                order_p=ORDER_P, order_q=ORDER_Q)
    assert out.shape == (N, Cout, H, W)
    assert jnp.allclose(out, ref, atol=2e-4, rtol=1e-3), "mismatch vs reference"

    print("KERNEL_OK")
</pallas_src>

<mosaic_0001>
module attributes {stable_mosaic.version = 11 : i64} {
  func.func @_kanvolution_kernel(%arg0: i32, %arg1: i32, %arg2: memref<1x8x128xf32, #tpu.memory_space<vmem>>, %arg3: memref<8x40xf32, #tpu.memory_space<vmem>>, %arg4: memref<8x40xf32, #tpu.memory_space<vmem>>, %arg5: memref<8x1xf32, #tpu.memory_space<vmem>>, %arg6: memref<1x8x128xf32, #tpu.memory_space<vmem>>) attributes {dimension_semantics = [#tpu.dimension_semantics<parallel>, #tpu.dimension_semantics<parallel>], iteration_bounds = array<i64: 2, 2>, scalar_prefetch = 0 : i64, scratch_operands = 0 : i64, tpu.core_type = #tpu.core_type<tc>, window_params = [{transform_indices = @transform_0, window_bounds = array<i64: 1, 8, 128>}, {pipeline_mode = #tpu.pipeline_mode<synchronous>, transform_indices = @transform_1, window_bounds = array<i64: 8, 40>}, {pipeline_mode = #tpu.pipeline_mode<synchronous>, transform_indices = @transform_2, window_bounds = array<i64: 8, 40>}, {pipeline_mode = #tpu.pipeline_mode<synchronous>, transform_indices = @transform_3, window_bounds = array<i64: 8, 1>}, {transform_indices = @transform_4, window_bounds = array<i64: 1, 8, 128>}]} {
    %c0 = arith.constant 0 : index
    %c0_0 = arith.constant 0 : index
    %c0_1 = arith.constant 0 : index
    %0 = vector.load %arg2[%c0, %c0_0, %c0_1] : memref<1x8x128xf32, #tpu.memory_space<vmem>>, vector<1x8x128xf32>
    %1 = vector.shape_cast %0 : vector<1x8x128xf32> to vector<8x128xf32>
    %2 = arith.mulf %1, %1 : vector<8x128xf32>
    %3 = arith.mulf %2, %1 : vector<8x128xf32>
    %4 = arith.mulf %3, %1 : vector<8x128xf32>
    %5 = arith.mulf %4, %1 : vector<8x128xf32>
    %6 = tpu.concatenate %1, %2, %3, %4, %5 in 0 : vector<8x128xf32>, vector<8x128xf32>, vector<8x128xf32>, vector<8x128xf32>, vector<8x128xf32> -> vector<40x128xf32>
    %c0_2 = arith.constant 0 : index
    %c0_3 = arith.constant 0 : index
    %7 = vector.load %arg5[%c0_2, %c0_3] : memref<8x1xf32, #tpu.memory_space<vmem>>, vector<8x1xf32>
    %8 = vector.shape_cast %7 : vector<8x1xf32> to vector<8x1xf32>
    %9 = vector.broadcast %8 : vector<8x1xf32> to vector<8x128xf32>
    %c0_4 = arith.constant 0 : index
    %c0_5 = arith.constant 0 : index
    %10 = vector.load %arg3[%c0_4, %c0_5] : memref<8x40xf32, #tpu.memory_space<vmem>>, vector<8x40xf32>
    %cst = arith.constant dense<0.000000e+00> : vector<8x128xf32>
    %11 = tpu.matmul %10, %6, %cst {dimension_numbers = #tpu.dot_dimension_numbers<[1], [0], [0], [1], [0, 0, 1, 1], [], []>} : vector<8x40xf32>, vector<40x128xf32>, vector<8x128xf32> -> vector<8x128xf32>
    %12 = arith.addf %9, %11 : vector<8x128xf32>
    %c0_6 = arith.constant 0 : index
    %c0_7 = arith.constant 0 : index
    %13 = vector.load %arg4[%c0_6, %c0_7] : memref<8x40xf32, #tpu.memory_space<vmem>>, vector<8x40xf32>
    %cst_8 = arith.constant dense<0.000000e+00> : vector<8x128xf32>
    %14 = tpu.matmul %13, %6, %cst_8 {dimension_numbers = #tpu.dot_dimension_numbers<[1], [0], [0], [1], [0, 0, 1, 1], [], []>} : vector<8x40xf32>, vector<40x128xf32>, vector<8x128xf32> -> vector<8x128xf32>
    %15 = math.absf %14 : vector<8x128xf32>
    %cst_9 = arith.constant 1.000000e+00 : f32
    %16 = vector.broadcast %cst_9 : f32 to vector<8x128xf32>
    %17 = arith.addf %16, %15 : vector<8x128xf32>
    %18 = tpu.reciprocal %17 {approx = true} : vector<8x128xf32> -> vector<8x128xf32>
    %19 = arith.mulf %17, %18 : vector<8x128xf32>
    %cst_10 = arith.constant 2.000000e+00 : f32
    %20 = vector.broadcast %cst_10 : f32 to vector<8x128xf32>
    %21 = arith.subf %20, %19 : vector<8x128xf32>
    %22 = arith.mulf %18, %21 : vector<8x128xf32>
    %23 = arith.mulf %12, %22 : vector<8x128xf32>
    %c0_11 = arith.constant 0 : index
    %c0_12 = arith.constant 0 : index
    %c0_13 = arith.constant 0 : index
    %24 = vector.load %arg6[%c0_11, %c0_12, %c0_13] : memref<1x8x128xf32, #tpu.memory_space<vmem>>, vector<1x8x128xf32>
    %25 = vector.shape_cast %24 : vector<1x8x128xf32> to vector<8x128xf32>
    %26 = vector.shape_cast %23 : vector<8x128xf32> to vector<1x8x128xf32>
    tpu.vector_store %arg6[%c0_11, %c0_12, %c0_13], %26 {strides = array<i32>} : memref<1x8x128xf32, #tpu.memory_space<vmem>>, vector<1x8x128xf32>,
    return
  }
  func.func @transform_0(%arg0: i32, %arg1: i32) -> (i32, i32, i32) {
    %c0_i32 = arith.constant 0 : i32
    %c0_i32_0 = arith.constant 0 : i32
    return %arg0, %c0_i32, %arg1 : i32, i32, i32
  }
  func.func @transform_1(%arg0: i32, %arg1: i32) -> (i32, i32) {
    %c0_i32 = arith.constant 0 : i32
    %c0_i32_0 = arith.constant 0 : i32
    %c0_i32_1 = arith.constant 0 : i32
    return %c0_i32, %c0_i32_0 : i32, i32
  }
  func.func @transform_2(%arg0: i32, %arg1: i32) -> (i32, i32) {
    %c0_i32 = arith.constant 0 : i32
    %c0_i32_0 = arith.constant 0 : i32
    %c0_i32_1 = arith.constant 0 : i32
    return %c0_i32, %c0_i32_0 : i32, i32
  }
  func.func @transform_3(%arg0: i32, %arg1: i32) -> (i32, i32) {
    %c0_i32 = arith.constant 0 : i32
    %c0_i32_0 = arith.constant 0 : i32
    %c0_i32_1 = arith.constant 0 : i32
    return %c0_i32, %c0_i32_0 : i32, i32
  }
  func.func @transform_4(%arg0: i32, %arg1: i32) -> (i32, i32, i32) {
    %c0_i32 = arith.constant 0 : i32
    %c0_i32_0 = arith.constant 0 : i32
    return %arg0, %c0_i32, %arg1 : i32, i32, i32
  }
}

module attributes {stable_mosaic.version = 11 : i64} {
  func.func @_kanvolution_kernel(%arg0: i32, %arg1: i32, %arg2: memref<1x8x128xf32, #tpu.memory_space<vmem>>, %arg3: memref<8x40xf32, #tpu.memory_space<vmem>>, %arg4: memref<8x40xf32, #tpu.memory_space<vmem>>, %arg5: memref<8x1xf32, #tpu.memory_space<vmem>>, %arg6: memref<1x8x128xf32, #tpu.memory_space<vmem>>) attributes {dimension_semantics = [#tpu.dimension_semantics<parallel>, #tpu.dimension_semantics<parallel>], iteration_bounds = array<i64: 2, 2>, scalar_prefetch = 0 : i64, scratch_operands = 0 : i64, tpu.core_type = #tpu.core_type<tc>, window_params = [{transform_indices = @transform_0, window_bounds = array<i64: 1, 8, 128>}, {pipeline_mode = #tpu.pipeline_mode<synchronous>, transform_indices = @transform_1, window_bounds = array<i64: 8, 40>}, {pipeline_mode = #tpu.pipeline_mode<synchronous>, transform_indices = @transform_2, window_bounds = array<i64: 8, 40>}, {pipeline_mode = #tpu.pipeline_mode<synchronous>, transform_indices = @transform_3, window_bounds = array<i64: 8, 1>}, {transform_indices = @transform_4, window_bounds = array<i64: 1, 8, 128>}]} {
    %c0 = arith.constant 0 : index
    %c0_0 = arith.constant 0 : index
    %c0_1 = arith.constant 0 : index
    %0 = vector.load %arg2[%c0, %c0_0, %c0_1] : memref<1x8x128xf32, #tpu.memory_space<vmem>>, vector<1x8x128xf32>
    %1 = vector.shape_cast %0 : vector<1x8x128xf32> to vector<8x128xf32>
    %2 = arith.mulf %1, %1 : vector<8x128xf32>
    %3 = arith.mulf %2, %1 : vector<8x128xf32>
    %4 = arith.mulf %3, %1 : vector<8x128xf32>
    %5 = arith.mulf %4, %1 : vector<8x128xf32>
    %6 = tpu.concatenate %1, %2, %3, %4, %5 in 0 : vector<8x128xf32>, vector<8x128xf32>, vector<8x128xf32>, vector<8x128xf32>, vector<8x128xf32> -> vector<40x128xf32>
    %c0_2 = arith.constant 0 : index
    %c0_3 = arith.constant 0 : index
    %7 = vector.load %arg5[%c0_2, %c0_3] : memref<8x1xf32, #tpu.memory_space<vmem>>, vector<8x1xf32>
    %8 = vector.shape_cast %7 : vector<8x1xf32> to vector<8x1xf32>
    %9 = vector.broadcast %8 : vector<8x1xf32> to vector<8x128xf32>
    %c0_4 = arith.constant 0 : index
    %c0_5 = arith.constant 0 : index
    %10 = vector.load %arg3[%c0_4, %c0_5] : memref<8x40xf32, #tpu.memory_space<vmem>>, vector<8x40xf32>
    %cst = arith.constant dense<0.000000e+00> : vector<8x128xf32>
    %11 = tpu.matmul %10, %6, %cst {dimension_numbers = #tpu.dot_dimension_numbers<[1], [0], [0], [1], [0, 0, 1, 1], [], []>} : vector<8x40xf32>, vector<40x128xf32>, vector<8x128xf32> -> vector<8x128xf32>
    %12 = arith.addf %9, %11 : vector<8x128xf32>
    %c0_6 = arith.constant 0 : index
    %c0_7 = arith.constant 0 : index
    %13 = vector.load %arg4[%c0_6, %c0_7] : memref<8x40xf32, #tpu.memory_space<vmem>>, vector<8x40xf32>
    %cst_8 = arith.constant dense<0.000000e+00> : vector<8x128xf32>
    %14 = tpu.matmul %13, %6, %cst_8 {dimension_numbers = #tpu.dot_dimension_numbers<[1], [0], [0], [1], [0, 0, 1, 1], [], []>} : vector<8x40xf32>, vector<40x128xf32>, vector<8x128xf32> -> vector<8x128xf32>
    %15 = math.absf %14 : vector<8x128xf32>
    %cst_9 = arith.constant 1.000000e+00 : f32
    %16 = vector.broadcast %cst_9 : f32 to vector<8x128xf32>
    %17 = arith.addf %16, %15 : vector<8x128xf32>
    %18 = tpu.reciprocal %17 {approx = true} : vector<8x128xf32> -> vector<8x128xf32>
    %19 = arith.mulf %17, %18 : vector<8x128xf32>
    %cst_10 = arith.constant 2.000000e+00 : f32
    %20 = vector.broadcast %cst_10 : f32 to vector<8x128xf32>
    %21 = arith.subf %20, %19 : vector<8x128xf32>
    %22 = arith.mulf %18, %21 : vector<8x128xf32>
    %23 = arith.mulf %12, %22 : vector<8x128xf32>
    %c0_11 = arith.constant 0 : index
    %c0_12 = arith.constant 0 : index
    %c0_13 = arith.constant 0 : index
    %24 = vector.load %arg6[%c0_11, %c0_12, %c0_13] : memref<1x8x128xf32, #tpu.memory_space<vmem>>, vector<1x8x128xf32>
    %25 = vector.shape_cast %24 : vector<1x8x128xf32> to vector<8x128xf32>
    %26 = vector.shape_cast %23 : vector<8x128xf32> to vector<1x8x128xf32>
    tpu.vector_store %arg6[%c0_11, %c0_12, %c0_13], %26 {strides = array<i32>} : memref<1x8x128xf32, #tpu.memory_space<vmem>>, vector<1x8x128xf32>,
    return
  }
  func.func @transform_0(%arg0: i32, %arg1: i32) -> (i32, i32, i32) {
    %c0_i32 = arith.constant 0 : i32
    %c0_i32_0 = arith.constant 0 : i32
    return %arg0, %c0_i32, %arg1 : i32, i32, i32
  }
  func.func @transform_1(%arg0: i32, %arg1: i32) -> (i32, i32) {
    %c0_i32 = arith.constant 0 : i32
    %c0_i32_0 = arith.constant 0 : i32
    %c0_i32_1 = arith.constant 0 : i32
    return %c0_i32, %c0_i32_0 : i32, i32
  }
  func.func @transform_2(%arg0: i32, %arg1: i32) -> (i32, i32) {
    %c0_i32 = arith.constant 0 : i32
    %c0_i32_0 = arith.constant 0 : i32
    %c0_i32_1 = arith.constant 0 : i32
    return %c0_i32, %c0_i32_0 : i32, i32
  }
  func.func @transform_3(%arg0: i32, %arg1: i32) -> (i32, i32) {
    %c0_i32 = arith.constant 0 : i32
    %c0_i32_0 = arith.constant 0 : i32
    %c0_i32_1 = arith.constant 0 : i32
    return %c0_i32, %c0_i32_0 : i32, i32
  }
  func.func @transform_4(%arg0: i32, %arg1: i32) -> (i32, i32, i32) {
    %c0_i32 = arith.constant 0 : i32
    %c0_i32_0 = arith.constant 0 : i32
    return %arg0, %c0_i32, %arg1 : i32, i32, i32
  }
}

</mosaic_0001>

<bundles_post_ra>
// kernel: tpu_custom_call.1
= control target key start
LH: loop header
LB: loop body
LE: loop exit
PB: predicated region body
PF: predicated region fallthrough
CT: control target
= control target key end

     0   :  { %s916_s0 = inlined_call_operand.hbm [shape: f32[2,8,256], index: 0, kind: input, shape index: {}]   ;;  %s917_s1 = inlined_call_operand.vmem [shape: f32[8,40], index: 1, kind: input, shape index: {}]   ;;  %s918_s2 = inlined_call_operand.hbm [shape: f32[8,40], index: 2, kind: input, shape index: {}]   ;;  %s919_s3 = inlined_call_operand.vmem [shape: f32[8,1], index: 3, kind: input, shape index: {}]   ;;  %s920_s4 = inlined_call_operand.hbm [shape: f32[2,8,256], index: 4, kind: output, shape index: {}]  }
   0x1   :  { %928 = sst [smem:[#allocation16_spill]] %s918_s2 }
   0x2   :  { %929 = sst [smem:[#allocation17_spill]] %s920_s4 }
   0x3   :  { %9 = vsyncpa [#allocation3], 0 }
   0x4   :  { %11 = vsyncpa [#allocation3 + $0x1], 0 }
   0x5   :  { %12 = vsyncpa [#allocation6], 0 }
   0x6   :  { %13 = vsyncpa [#allocation4], 0 }
   0x7   :  { %15 = vsyncpa [#allocation4 + $0x1], 0  ;;  %s733_s15 = smov 0   ;;  %s735_s16 = smov 0  }
   0x8   :  { %s737_s17 = smov 0   ;;  %s739_s18 = smov 0  }
   0x9   :  { %s741_s19 = smov 0   ;;  %s743_s20 = smov 0  }
   0xa   :  { %s745_s21 = smov 0   ;;  %s747_s22 = smov 0  }
   0xb LB: > { %930 = sst [smem:[#allocation11_spill]] %s676_s15  ;;  %s430_s23 = sadd.s32 4294967295, %s704_s22   ;;  %s704_s22 = sphi %s747_s22, %s21_s22   ;;  %s700_s21 = sphi %s745_s21, %s955_s21   ;;  %s696_s20 = sphi %s743_s20, %s954_s20   ;;  %s692_s19 = sphi %s741_s19, %s953_s19   ;;  %s688_s18 = sphi %s739_s18, %s952_s18   ;;  %s684_s17 = sphi %s737_s17, %s951_s17   ;;  %s680_s16 = sphi %s735_s16, %s950_s16   ;;  %s676_s15 = sphi %s733_s15, %s949_s15  }
   0xc   : > { %s431_s24 = sadd.s32 4294967294, %s704_s22   ;;  %p55_p0 = scmp.ne.s32.totalorder %s680_s16, %s676_s15 }
   0xd   : > { %p777_p1 = scmp.eq.s32.totalorder %s430_s23, 0  ;;  %p781_p2 = scmp.eq.s32.totalorder %s430_s23, 3 }
   0xe   : > { %p150_p3 = scmp.eq.s32.totalorder %s431_s24, 3  ;;  %p432_p5 = scmp.ge.s32.totalorder %s704_s22, 1 }
   0xf   : > { %p787_p4 = por %p777_p1, %p55_p0  ;;  %p157_p7 = scmp.lt.s32.totalorder %s704_s22, 5 }
  0x10   : > { %p792_p6 = por %p150_p3, %p55_p0  ;;  %s936_s2 = sld [smem:[#allocation16_spill]] }
  0x11   : > { %p800_p8 = pnand %p432_p5, %p157_p7  ;;  %s706_s7 = smov [#allocation5]  }
  0x12   : > { %s934_s28 = scalar_select %p792_p6, 1, 0 }
  0x13   : > { %p457_p9 = pneg %p800_p8  ;;  %s174_s8 = sshll.u32 %s706_s7, 4  ;;  %s175_s8 = int_to_ptr.vmem [resolvable:$true] %s174_s8 }
  0x14   : > { %935 = sst [smem:[#allocation12_spill]] %s934_s28  ;;  %s30_s9 = sadd.s32 1, %s696_s20 }
  0x15   : > { %p458_p10 = pnand %p457_p9, %p777_p1  ;;  %p31_p11 = scmp.ge.s32.totalorder %s30_s9, 2 }
  0x16   : > { %s172_s5 = sshll.u32 %s936_s2, 4  ;;  %s33_s10 = sadd.s32 1, %s700_s21  ;;  %s173_s5 = int_to_ptr.hbm [resolvable:$true] %s172_s5 }
  0x17   : > { %460 = dma.hbm_to_vmem [thread:$0]  (!%p458_p10), %s173_s5, 128, %s175_s8, [#allocation6]  }
  0x18   : > { %s42_s11 = sadd.s32 1, %s684_s17  ;;  %p49_p12 = scmp.ne.s32.totalorder %s684_s17, %s680_s16 }
  0x19   : > { %s957_s9 = smov (%p31_p11, %s30_s9), 0  ;;  %s959_s10 = smov (!%p31_p11, %s33_s10), %s700_s21 }
  0x1a   : > { %938 = sst [smem:[#allocation13_spill]] %s957_s9  ;;  %s38_s12 = ssub.s32 %s696_s20, %s957_s9 }
  0x1b   : > { %p50_p13 = scmp.eq.s32.totalorder %s704_s22, 0  ;;  %p35_p0 = scmp.ge.s32.totalorder %s959_s10, 2 }
  0x1c   : > { %p821_p3 = por %p781_p2, %p49_p12  ;;  %p470_p7 = scmp.lt.s32.totalorder %s704_s22, 4 }
  0x1d   : > { %p825_p5 = por %p50_p13, %p49_p12  ;;  %s961_s10 = smov (%p35_p0, %s959_s10), 0 }
  0x1e   : > { %s939_s13 = scalar_select %p821_p3, 1, 0 }
  0x1f   : > { %942 = sst [smem:[#allocation15_spill]] %s961_s10  ;;  %s188_s23 = sand.u32 1, %s684_s17  }
  0x20   : > { %940 = sst [smem:[#allocation14_spill]] %s939_s13  ;;  %s436_s24 = sshll.u32 %s700_s21, 1 }
  0x21   : > { %s37_s29 = ssub.s32 %s700_s21, %s961_s10  ;;  %s435_s5 = sshll.u32 %s188_s23, 3 }
  0x22   : > { %s39_s30 = sor.u32 %s38_s12, %s37_s29  ;;  %s196_s26 = sadd.s32 %s696_s20, %s436_s24 }
  0x23   : > { %p40_p9 = scmp.eq.s32.totalorder %s39_s30, 0  ;;  %s192_s7 = scalar_lea.vmem [#allocation2], %s435_s5 }
  0x24   : > { %s202_s8 = sshll.u32 %s192_s7, 4  ;;  %s437_s9 = sshll.u32 %s196_s26, 3  ;;  %s203_s8 = int_to_ptr.vmem [resolvable:$true] %s202_s8 }
  0x25   : > { %s838_s2 = scalar_select %p40_p9, %s684_s17, %s42_s11  }
  0x26   : > { %s198_s13 = scalar_lea.hbm %s916_s0, %s437_s9  ;;  %p462_p2 = pnand %p470_p7, %p825_p5 }
  0x27   : > { %s200_s4 = sshll.u32 %s198_s13, 4  ;;  %s189_s10 = scalar_lea.sflag [#allocation3], %s188_s23  ;;  %s201_s4 = int_to_ptr.hbm [resolvable:$true] %s200_s4 }
  0x28   : > { %464 = dma.hbm_to_vmem [thread:$0]  (!%p462_p2), %s201_s4, 128, %s203_s8, %s189_s10  }
  0x29   : > { %211 = sbr.rel (%p800_p8) target bundleno = 215 (0xd7), region = 36  ;;  %s850_s11 = sand.u32 (!%p800_p8), 1, %s680_s16  }
  0x2a   : > { %s439_s12 = sshll.u32 (!%p800_p8), %s850_s11, 3  ;;  %s214_s15 = scalar_lea.sflag (!%p800_p8), [#allocation3], %s850_s11 }
  0x2b   : > { %s217_s28 = scalar_lea.vmem (!%p800_p8), [#allocation2], %s439_s12 }
  0x2e   : > { %663 = dma.done.wait (%p787_p4), %s214_s15, 128  }
  0x2f   : > { %665 = vsyncadd (%p787_p4), %s214_s15, 4294967168 }
  0x30   : > { %667 = dma.done.wait (%p777_p1), [#allocation6], 128  }
  0x31   : > { %669 = vsyncadd (%p777_p1), [#allocation6], 4294967168  ;;  %v707_v0 = vmov 0   ;;  %v248_v1 = vld [vmem:[%s217_s28] sm:$0xff]  ;;  %vm260_vm0 = vcmask 326656   ;;  %v285_v7 = vld [vmem:[#allocation5] sm:$0xff] }
  0x32   : > { %539 = vset.pattern.permute.xlu0 %v707_v0  ;;  %v249_v2 = vmul.f32 %v248_v1, %v248_v1  ;;  %v253_v3 = vld [vmem:[%s919_s3] sm:$0xff]  ;;  %s445_s9 = sshll.u32 %s692_s19, 1  ;;  %s943_s24 = sld [smem:[#allocation17_spill]] }
  0x33   : > { %256 = vperm.xlu0 %539, %v253_v3   ;;  %v259_v8 = vld [vmem:[%s917_s1] sm:$0xff]  ;;  %s328_s10 = sadd.s32 %s688_s18, %s445_s9  ;;  %s247_s5 = scalar_lea.vmem [#allocation7], %s439_s12 }
  0x34   : > { %v250_v4 = vmul.f32 %v249_v2, %v248_v1  ;;  %s446_s13 = sshll.u32 %s328_s10, 3  ;;  %s332_s26 = sshll.u32 %s247_s5, 4  ;;  %s333_s26 = int_to_ptr.vmem [resolvable:$true] %s332_s26 }
  0x35   : > { %s318_s18 = scalar_lea.sflag [#allocation4], %s850_s11 }
  0x36   : > { %v251_v5 = vmul.f32 %v250_v4, %v248_v1 }
  0x38   : > { %v252_v6 = vmul.f32 %v251_v5, %v248_v1  ;;  %s330_s29 = scalar_lea.hbm %s943_s24, %s446_s13  ;;  %s622_s4 = scalar_lea.hbm %s943_s24, 32 }
  0x39   : > { %s334_s7 = sshll.u32 %s330_s29, 4  ;;  %s335_s7 = int_to_ptr.hbm [resolvable:$true] %s334_s7 }
  0x3a   : > { %300 = vmatpush.msra.mxu1 %v252_v6  ;;  %275 = vmatpush.msra.mxu0 %v252_v6  ;;  %s616_s19 = sshra.s32 %s335_s7, 4  ;;  %s617_s19 = int_to_ptr.hbm [resolvable:$true] %s616_s19 }
  0x3b   : > { %s618_s8 = scalar_lea.hbm %s617_s19, 8  ;;  %p623_p10 = scmp.lt.s32.totalorder %s617_s19, %s943_s24 }
  0x3c   : > { %301 = vmatpush.msra.mxu1 %v251_v5  ;;  %276 = vmatpush.msra.mxu0 %v251_v5  ;;  %p619_p1 = scmp.ne.s32.totalorder %s617_s19, %s618_s8  ;;  %p624_p11 = scmp.lt.s32.totalorder %s622_s4, %s618_s8 }
  0x3e   : > { %302 = vmatpush.msra.mxu1 %v250_v4  ;;  %277 = vmatpush.msra.mxu0 %v250_v4  ;;  %p620_p4 = pnand %p619_p1, %p821_p3  ;;  %p625_p12 = por %p624_p11, %p623_p10 }
  0x40   : > { %303 = vmatpush.msra.mxu1 %v249_v2  ;;  %278 = vmatpush.msra.mxu0 %v249_v2  ;;  %p621_p8 = pneg %p620_p4 }
  0x42   : > { %304 = vmatpush.msra.mxu1 %v248_v1  ;;  %279 = vmatpush.msra.mxu0 %v248_v1  ;;  %p626_p13 = pnand %p625_p12, %p621_p8 }
  0x43   : > { %443 = vmatmul.msk.f32.vlgmr.msra.gmra.mxu1 %vm260_vm0, %v285_v7  ;;  %442 = vmatmul.msk.f32.vlgmr.msra.gmra.mxu0 %vm260_vm0, %v259_v8 }
  0xa5   : > { %v257_v13 = vpop.permute.xlu0 %256 }
  0xc0   : > { %v306_v9 = vpop.f32.mrf.mxu1  ;;  %v281_v14 = vpop.f32.mrf.mxu0 }
  0xc1   : > { %v309_v10 = vand.u32 2147483647, %v306_v9  ;;  %v284_v17 = vadd.f32 %v281_v14, %v257_v13 }
  0xc3   : > { %v310_v11 = vadd.f32 1.0, %v309_v10 }
  0xc5   : > { %540 = vrcp.f32 %v310_v11 }
  0xcb   : > { %v541_v12 = vpop.eup %540 }
  0xcc   : > { %v312_v15 = vmul.f32 %v541_v12, %v310_v11 }
  0xce   : > { %v313_v16 = vsub.f32 2.0, %v312_v15 }
  0xd0   : > { %v314_v18 = vmul.f32 %v541_v12, %v313_v16 }
  0xd2   : > { %v315_v19 = vmul.f32 %v314_v18, %v284_v17 }
  0xd4   : > { %316 = vst [vmem:[%s247_s5] sm:$0xff] %v315_v19 }
  0xd5   : > { %629 = shalt.err (!%p626_p13)
}
  0xd6   : > { %455 = dma.vmem_to_hbm [thread:$0]  (%p821_p3), %s333_s26, 128, %s335_s7, %s318_s18  }
  0xd7 PF: > { %s945_s11 = sld [smem:[#allocation11_spill]]  ;;  %p472_p0 = scmp.ge.s32.totalorder %s704_s22, 2 }
  0xd9   : > { %p466_p5 = pnand %p472_p0, %p792_p6 }
  0xdb   : > { %p467_p7 = pneg %p466_p5 }
  0xdd   : > { %s346_s27 = sand.u32 1, %s945_s11  }
  0xde   : > { %s347_s9 = scalar_lea.sflag [#allocation4], %s346_s27 }
  0xdf   : > { %671 = dma.done.wait (%p467_p7), %s347_s9, 128  }
  0xe0   : > { %673 = vsyncadd (%p467_p7), %s347_s9, 4294967168  ;;  %s21_s22 = sadd.s32 1, %s704_s22   ;;  %s947_s10 = sld [smem:[#allocation13_spill]] }
  0xe1   : > { %p18_p9 = scmp.ge.s32.totalorder %s21_s22, 6   ;;  %s948_s13 = sld [smem:[#allocation15_spill]] }
  0xe2   : > { %s949_s15 = smov %s680_s16  ;;  %s950_s16 = smov %s684_s17 }
  0xe3   : > { %s951_s17 = smov %s838_s2  ;;  %s952_s18 = smov %s696_s20 }
  0xe4   : > { %s953_s19 = smov %s700_s21  ;;  %20 = sbr.rel (!%p18_p9) target bundleno = 11 (0xb), region = 85 }
  0xe6   : > { %s954_s20 = smov %s947_s10 }
  0xe7   : > { %s955_s21 = smov %s948_s13 }
  0xe9   :  { %353 = vsyncpa [#allocation3], 1 }
  0xea   :  { %355 = vsyncpa [#allocation3 + $0x1], 1 }
  0xeb   :  { %356 = vsyncpa [#allocation6], 1 }
  0xec   :  { %357 = vsyncpa [#allocation4], 1 }
  0xed   :  { %359 = vsyncpa [#allocation4 + $0x1], 1 }

// kernel: tpu_custom_call.1
= control target key start
LH: loop header
LB: loop body
LE: loop exit
PB: predicated region body
PF: predicated region fallthrough
CT: control target
= control target key end

     0   :  { %s916_s0 = inlined_call_operand.hbm [shape: f32[2,8,256], index: 0, kind: input, shape index: {}]   ;;  %s917_s1 = inlined_call_operand.vmem [shape: f32[8,40], index: 1, kind: input, shape index: {}]   ;;  %s918_s2 = inlined_call_operand.hbm [shape: f32[8,40], index: 2, kind: input, shape index: {}]   ;;  %s919_s3 = inlined_call_operand.vmem [shape: f32[8,1], index: 3, kind: input, shape index: {}]   ;;  %s920_s4 = inlined_call_operand.hbm [shape: f32[2,8,256], index: 4, kind: output, shape index: {}]  }
   0x1   :  { %928 = sst [smem:[#allocation16_spill]] %s918_s2 }
   0x2   :  { %929 = sst [smem:[#allocation17_spill]] %s920_s4 }
   0x3   :  { %9 = vsyncpa [#allocation3], 0 }
   0x4   :  { %11 = vsyncpa [#allocation3 + $0x1], 0 }
   0x5   :  { %12 = vsyncpa [#allocation6], 0 }
   0x6   :  { %13 = vsyncpa [#allocation4], 0 }
   0x7   :  { %15 = vsyncpa [#allocation4 + $0x1], 0  ;;  %s733_s15 = smov 0   ;;  %s735_s16 = smov 0  }
   0x8   :  { %s737_s17 = smov 0   ;;  %s739_s18 = smov 0  }
   0x9   :  { %s741_s19 = smov 0   ;;  %s743_s20 = smov 0  }
   0xa   :  { %s745_s21 = smov 0   ;;  %s747_s22 = smov 0  }
   0xb LB: > { %930 = sst [smem:[#allocation11_spill]] %s676_s15  ;;  %s430_s23 = sadd.s32 4294967295, %s704_s22   ;;  %s704_s22 = sphi %s747_s22, %s21_s22   ;;  %s700_s21 = sphi %s745_s21, %s955_s21   ;;  %s696_s20 = sphi %s743_s20, %s954_s20   ;;  %s692_s19 = sphi %s741_s19, %s953_s19   ;;  %s688_s18 = sphi %s739_s18, %s952_s18   ;;  %s684_s17 = sphi %s737_s17, %s951_s17   ;;  %s680_s16 = sphi %s735_s16, %s950_s16   ;;  %s676_s15 = sphi %s733_s15, %s949_s15  }
   0xc   : > { %s431_s24 = sadd.s32 4294967294, %s704_s22   ;;  %p55_p0 = scmp.ne.s32.totalorder %s680_s16, %s676_s15 }
   0xd   : > { %p777_p1 = scmp.eq.s32.totalorder %s430_s23, 0  ;;  %p781_p2 = scmp.eq.s32.totalorder %s430_s23, 3 }
   0xe   : > { %p150_p3 = scmp.eq.s32.totalorder %s431_s24, 3  ;;  %p432_p5 = scmp.ge.s32.totalorder %s704_s22, 1 }
   0xf   : > { %p787_p4 = por %p777_p1, %p55_p0  ;;  %p157_p7 = scmp.lt.s32.totalorder %s704_s22, 5 }
  0x10   : > { %p792_p6 = por %p150_p3, %p55_p0  ;;  %s936_s2 = sld [smem:[#allocation16_spill]] }
  0x11   : > { %p800_p8 = pnand %p432_p5, %p157_p7  ;;  %s706_s7 = smov [#allocation5]  }
  0x12   : > { %s934_s28 = scalar_select %p792_p6, 1, 0 }
  0x13   : > { %p457_p9 = pneg %p800_p8  ;;  %s174_s8 = sshll.u32 %s706_s7, 4  ;;  %s175_s8 = int_to_ptr.vmem [resolvable:$true] %s174_s8 }
  0x14   : > { %935 = sst [smem:[#allocation12_spill]] %s934_s28  ;;  %s30_s9 = sadd.s32 1, %s696_s20 }
  0x15   : > { %p458_p10 = pnand %p457_p9, %p777_p1  ;;  %p31_p11 = scmp.ge.s32.totalorder %s30_s9, 2 }
  0x16   : > { %s172_s5 = sshll.u32 %s936_s2, 4  ;;  %s33_s10 = sadd.s32 1, %s700_s21  ;;  %s173_s5 = int_to_ptr.hbm [resolvable:$true] %s172_s5 }
  0x17   : > { %460 = dma.hbm_to_vmem [thread:$0]  (!%p458_p10), %s173_s5, 128, %s175_s8, [#allocation6]  }
  0x18   : > { %s42_s11 = sadd.s32 1, %s684_s17  ;;  %p49_p12 = scmp.ne.s32.totalorder %s684_s17, %s680_s16 }
  0x19   : > { %s957_s9 = smov (%p31_p11, %s30_s9), 0  ;;  %s959_s10 = smov (!%p31_p11, %s33_s10), %s700_s21 }
  0x1a   : > { %938 = sst [smem:[#allocation13_spill]] %s957_s9  ;;  %s38_s12 = ssub.s32 %s696_s20, %s957_s9 }
  0x1b   : > { %p50_p13 = scmp.eq.s32.totalorder %s704_s22, 0  ;;  %p35_p0 = scmp.ge.s32.totalorder %s959_s10, 2 }
  0x1c   : > { %p821_p3 = por %p781_p2, %p49_p12  ;;  %p470_p7 = scmp.lt.s32.totalorder %s704_s22, 4 }
  0x1d   : > { %p825_p5 = por %p50_p13, %p49_p12  ;;  %s961_s10 = smov (%p35_p0, %s959_s10), 0 }
  0x1e   : > { %s939_s13 = scalar_select %p821_p3, 1, 0 }
  0x1f   : > { %942 = sst [smem:[#allocation15_spill]] %s961_s10  ;;  %s188_s23 = sand.u32 1, %s684_s17  }
  0x20   : > { %940 = sst [smem:[#allocation14_spill]] %s939_s13  ;;  %s436_s24 = sshll.u32 %s700_s21, 1 }
  0x21   : > { %s37_s29 = ssub.s32 %s700_s21, %s961_s10  ;;  %s435_s5 = sshll.u32 %s188_s23, 3 }
  0x22   : > { %s39_s30 = sor.u32 %s38_s12, %s37_s29  ;;  %s196_s26 = sadd.s32 %s696_s20, %s436_s24 }
  0x23   : > { %p40_p9 = scmp.eq.s32.totalorder %s39_s30, 0  ;;  %s192_s7 = scalar_lea.vmem [#allocation2], %s435_s5 }
  0x24   : > { %s202_s8 = sshll.u32 %s192_s7, 4  ;;  %s437_s9 = sshll.u32 %s196_s26, 3  ;;  %s203_s8 = int_to_ptr.vmem [resolvable:$true] %s202_s8 }
  0x25   : > { %s838_s2 = scalar_select %p40_p9, %s684_s17, %s42_s11  }
  0x26   : > { %s198_s13 = scalar_lea.hbm %s916_s0, %s437_s9  ;;  %p462_p2 = pnand %p470_p7, %p825_p5 }
  0x27   : > { %s200_s4 = sshll.u32 %s198_s13, 4  ;;  %s189_s10 = scalar_lea.sflag [#allocation3], %s188_s23  ;;  %s201_s4 = int_to_ptr.hbm [resolvable:$true] %s200_s4 }
  0x28   : > { %464 = dma.hbm_to_vmem [thread:$0]  (!%p462_p2), %s201_s4, 128, %s203_s8, %s189_s10  }
  0x29   : > { %211 = sbr.rel (%p800_p8) target bundleno = 215 (0xd7), region = 36  ;;  %s850_s11 = sand.u32 (!%p800_p8), 1, %s680_s16  }
  0x2a   : > { %s439_s12 = sshll.u32 (!%p800_p8), %s850_s11, 3  ;;  %s214_s15 = scalar_lea.sflag (!%p800_p8), [#allocation3], %s850_s11 }
  0x2b   : > { %s217_s28 = scalar_lea.vmem (!%p800_p8), [#allocation2], %s439_s12 }
  0x2e   : > { %663 = dma.done.wait (%p787_p4), %s214_s15, 128  }
  0x2f   : > { %665 = vsyncadd (%p787_p4), %s214_s15, 4294967168 }
  0x30   : > { %667 = dma.done.wait (%p777_p1), [#allocation6], 128  }
  0x31   : > { %669 = vsyncadd (%p777_p1), [#allocation6], 4294967168  ;;  %v707_v0 = vmov 0   ;;  %v248_v1 = vld [vmem:[%s217_s28] sm:$0xff]  ;;  %vm260_vm0 = vcmask 326656   ;;  %v285_v7 = vld [vmem:[#allocation5] sm:$0xff] }
  0x32   : > { %539 = vset.pattern.permute.xlu0 %v707_v0  ;;  %v249_v2 = vmul.f32 %v248_v1, %v248_v1  ;;  %v253_v3 = vld [vmem:[%s919_s3] sm:$0xff]  ;;  %s445_s9 = sshll.u32 %s692_s19, 1  ;;  %s943_s24 = sld [smem:[#allocation17_spill]] }
  0x33   : > { %256 = vperm.xlu0 %539, %v253_v3   ;;  %v259_v8 = vld [vmem:[%s917_s1] sm:$0xff]  ;;  %s328_s10 = sadd.s32 %s688_s18, %s445_s9  ;;  %s247_s5 = scalar_lea.vmem [#allocation7], %s439_s12 }
  0x34   : > { %v250_v4 = vmul.f32 %v249_v2, %v248_v1  ;;  %s446_s13 = sshll.u32 %s328_s10, 3  ;;  %s332_s26 = sshll.u32 %s247_s5, 4  ;;  %s333_s26 = int_to_ptr.vmem [resolvable:$true] %s332_s26 }
  0x35   : > { %s318_s18 = scalar_lea.sflag [#allocation4], %s850_s11 }
  0x36   : > { %v251_v5 = vmul.f32 %v250_v4, %v248_v1 }
  0x38   : > { %v252_v6 = vmul.f32 %v251_v5, %v248_v1  ;;  %s330_s29 = scalar_lea.hbm %s943_s24, %s446_s13  ;;  %s622_s4 = scalar_lea.hbm %s943_s24, 32 }
  0x39   : > { %s334_s7 = sshll.u32 %s330_s29, 4  ;;  %s335_s7 = int_to_ptr.hbm [resolvable:$true] %s334_s7 }
  0x3a   : > { %300 = vmatpush.msra.mxu1 %v252_v6  ;;  %275 = vmatpush.msra.mxu0 %v252_v6  ;;  %s616_s19 = sshra.s32 %s335_s7, 4  ;;  %s617_s19 = int_to_ptr.hbm [resolvable:$true] %s616_s19 }
  0x3b   : > { %s618_s8 = scalar_lea.hbm %s617_s19, 8  ;;  %p623_p10 = scmp.lt.s32.totalorder %s617_s19, %s943_s24 }
  0x3c   : > { %301 = vmatpush.msra.mxu1 %v251_v5  ;;  %276 = vmatpush.msra.mxu0 %v251_v5  ;;  %p619_p1 = scmp.ne.s32.totalorder %s617_s19, %s618_s8  ;;  %p624_p11 = scmp.lt.s32.totalorder %s622_s4, %s618_s8 }
  0x3e   : > { %302 = vmatpush.msra.mxu1 %v250_v4  ;;  %277 = vmatpush.msra.mxu0 %v250_v4  ;;  %p620_p4 = pnand %p619_p1, %p821_p3  ;;  %p625_p12 = por %p624_p11, %p623_p10 }
  0x40   : > { %303 = vmatpush.msra.mxu1 %v249_v2  ;;  %278 = vmatpush.msra.mxu0 %v249_v2  ;;  %p621_p8 = pneg %p620_p4 }
  0x42   : > { %304 = vmatpush.msra.mxu1 %v248_v1  ;;  %279 = vmatpush.msra.mxu0 %v248_v1  ;;  %p626_p13 = pnand %p625_p12, %p621_p8 }
  0x43   : > { %443 = vmatmul.msk.f32.vlgmr.msra.gmra.mxu1 %vm260_vm0, %v285_v7  ;;  %442 = vmatmul.msk.f32.vlgmr.msra.gmra.mxu0 %vm260_vm0, %v259_v8 }
  0xa5   : > { %v257_v13 = vpop.permute.xlu0 %256 }
  0xc0   : > { %v306_v9 = vpop.f32.mrf.mxu1  ;;  %v281_v14 = vpop.f32.mrf.mxu0 }
  0xc1   : > { %v309_v10 = vand.u32 2147483647, %v306_v9  ;;  %v284_v17 = vadd.f32 %v281_v14, %v257_v13 }
  0xc3   : > { %v310_v11 = vadd.f32 1.0, %v309_v10 }
  0xc5   : > { %540 = vrcp.f32 %v310_v11 }
  0xcb   : > { %v541_v12 = vpop.eup %540 }
  0xcc   : > { %v312_v15 = vmul.f32 %v541_v12, %v310_v11 }
  0xce   : > { %v313_v16 = vsub.f32 2.0, %v312_v15 }
  0xd0   : > { %v314_v18 = vmul.f32 %v541_v12, %v313_v16 }
  0xd2   : > { %v315_v19 = vmul.f32 %v314_v18, %v284_v17 }
  0xd4   : > { %316 = vst [vmem:[%s247_s5] sm:$0xff] %v315_v19 }
  0xd5   : > { %629 = shalt.err (!%p626_p13)
}
  0xd6   : > { %455 = dma.vmem_to_hbm [thread:$0]  (%p821_p3), %s333_s26, 128, %s335_s7, %s318_s18  }
  0xd7 PF: > { %s945_s11 = sld [smem:[#allocation11_spill]]  ;;  %p472_p0 = scmp.ge.s32.totalorder %s704_s22, 2 }
  0xd9   : > { %p466_p5 = pnand %p472_p0, %p792_p6 }
  0xdb   : > { %p467_p7 = pneg %p466_p5 }
  0xdd   : > { %s346_s27 = sand.u32 1, %s945_s11  }
  0xde   : > { %s347_s9 = scalar_lea.sflag [#allocation4], %s346_s27 }
  0xdf   : > { %671 = dma.done.wait (%p467_p7), %s347_s9, 128  }
  0xe0   : > { %673 = vsyncadd (%p467_p7), %s347_s9, 4294967168  ;;  %s21_s22 = sadd.s32 1, %s704_s22   ;;  %s947_s10 = sld [smem:[#allocation13_spill]] }
  0xe1   : > { %p18_p9 = scmp.ge.s32.totalorder %s21_s22, 6   ;;  %s948_s13 = sld [smem:[#allocation15_spill]] }
  0xe2   : > { %s949_s15 = smov %s680_s16  ;;  %s950_s16 = smov %s684_s17 }
  0xe3   : > { %s951_s17 = smov %s838_s2  ;;  %s952_s18 = smov %s696_s20 }
  0xe4   : > { %s953_s19 = smov %s700_s21  ;;  %20 = sbr.rel (!%p18_p9) target bundleno = 11 (0xb), region = 85 }
  0xe6   : > { %s954_s20 = smov %s947_s10 }
  0xe7   : > { %s955_s21 = smov %s948_s13 }
  0xe9   :  { %353 = vsyncpa [#allocation3], 1 }
  0xea   :  { %355 = vsyncpa [#allocation3 + $0x1], 1 }
  0xeb   :  { %356 = vsyncpa [#allocation6], 1 }
  0xec   :  { %357 = vsyncpa [#allocation4], 1 }
  0xed   :  { %359 = vsyncpa [#allocation4 + $0x1], 1 }

</bundles_post_ra>
